<compile_context>
chip_gen: v7x
topology: tpu7x:2x2x1
jax: 0.10.0
libtpu: 0.0.40
codegen_flags: <defaults>
</compile_context>

<pallas_src>
import functools

import jax
import jax.numpy as jnp
from jax.experimental import pallas as pl
from jax.experimental.pallas import tpu as pltpu

MIB = 1024 * 1024


def _cdiv(a, b):
    return -(-a // b)


@functools.lru_cache(maxsize=1)
def _device_vmem_bytes():
    """Physical VMEM capacity (per TensorCore), with a conservative fallback."""
    try:
        info = pltpu.get_tpu_info()
        for attr in ("vmem_capacity_bytes", "vmem_bytes", "vmem_size_bytes"):
            v = getattr(info, attr, None)
            if v:
                return int(v)
    except Exception:
        pass
    return 64 * MIB  # v7x-safe fallback


# ----------------------------------------------------------------------------
# Lane-packing geometry.
# ----------------------------------------------------------------------------
def _lane_geometry(h):
    """Return (h_pad, pack, lane_width) for channel count h."""
    if h >= 128:
        hp = _cdiv(h, 128) * 128
        return hp, 1, hp
    hp = 1 << (h - 1).bit_length() if h > 1 else 1  # next pow2, divides 128
    return hp, 128 // hp, 128


def _to_packed(x_flat, pack, lane_w):
    """(R, Hp) -> (cdiv(R, pack), lane_w).  Pads rows only if R % pack != 0
    (the reshape itself is a free, order-preserving bitcast)."""
    r = x_flat.shape[0]
    rp = _cdiv(r, pack)
    if rp * pack != r:
        x_flat = jnp.pad(x_flat, ((0, rp * pack - r), (0, 0)))
    return x_flat.reshape(rp, lane_w), rp


def _choose_row_tiling(rp, lane_w, tile_rows_max):
    """Pick (tile_rows, n_splits, tiles_per_split) for packed rows rp.
    ~4 MiB blocks; 2-way split so the grid can shard across v7x's 2 TCs."""
    bytes_per_row = lane_w * 4
    cap = max(8, (4 * MIB // bytes_per_row) // 8 * 8)
    tr_max = max(8, (min(tile_rows_max, cap) // 8) * 8)
    n_splits = 2 if rp >= 16 else 1
    tiles_per_split = max(1, _cdiv(rp, tr_max * n_splits))
    tile_rows = 8 * _cdiv(rp, 8 * n_splits * tiles_per_split)
    tile_rows = max(8, min(tile_rows, tr_max))
    return tile_rows, n_splits, tiles_per_split


# ----------------------------------------------------------------------------
# Kernel 1 (two-pass path): per-lane reduction over packed rows.
# Grid = (n_splits, tiles_per_split).  Output block (1, 8, W) is resident
# across the inner "arbitrary" axis and used directly as accumulator; the hot
# loop is pure VPU adds over vreg tiles.  The (rare) ragged last block is
# zero-masked with an iota row mask so no wrapper-side row pad is needed.
# ----------------------------------------------------------------------------
def _accumulate_kernel(x_ref, sum_ref, sumsq_ref, *, rp, tile_rows,
                       tiles_per_split, mask_tail):
    @pl.when(pl.program_id(1) == 0)
    def _():
        sum_ref[...] = jnp.zeros_like(sum_ref)
        sumsq_ref[...] = jnp.zeros_like(sumsq_ref)

    xt = x_ref[...].astype(jnp.float32)
    w = xt.shape[-1]
    if mask_tail:
        blk = pl.program_id(0) * tiles_per_split + pl.program_id(1)
        valid = rp - blk * tile_rows
        rows = jax.lax.broadcasted_iota(jnp.int32, (tile_rows, 1), 0)
        xt = jnp.where(rows < valid, xt, 0.0)
    x3 = xt.reshape(-1, 8, w)                      # vreg-tile split: layout-free
    sum_ref[...] += jnp.sum(x3, axis=0, keepdims=True)
    sumsq_ref[...] += jnp.sum(x3 * x3, axis=0, keepdims=True)


def pallas_accumulate(xp, tile_rows, n_splits, tiles_per_split, vmem_limit):
    rp, w = xp.shape
    mask_tail = (tile_rows * n_splits * tiles_per_split != rp)
    kernel = functools.partial(_accumulate_kernel, rp=rp, tile_rows=tile_rows,
                               tiles_per_split=tiles_per_split,
                               mask_tail=mask_tail)
    return pl.pallas_call(
        kernel,
        out_shape=(
            jax.ShapeDtypeStruct((n_splits, 8, w), jnp.float32),
            jax.ShapeDtypeStruct((n_splits, 8, w), jnp.float32),
        ),
        grid=(n_splits, tiles_per_split),
        in_specs=[
            pl.BlockSpec((tile_rows, w),
                         lambda c, i: (c * tiles_per_split + i, 0)),
        ],
        out_specs=(
            pl.BlockSpec((1, 8, w), lambda c, i: (c, 0, 0)),
            pl.BlockSpec((1, 8, w), lambda c, i: (c, 0, 0)),
        ),
        compiler_params=pltpu.CompilerParams(
            dimension_semantics=("parallel", "arbitrary"),
            vmem_limit_bytes=vmem_limit,
        ),
    )(xp)


# ----------------------------------------------------------------------------
# Kernel 2 (two-pass path): normalization with hoisted statistics.
# stats: (2, W) stacked -> row 0 = mean (lane-tiled), row 1 = 1/std.
# Grid may be a ceiling division: out-of-bounds writes of the partial last
# block are dropped by Pallas, so no row pad / slice is needed.
# ----------------------------------------------------------------------------
def _normalize_kernel(stats_ref, x_ref, o_ref):
    st = stats_ref[...]
    mean = st[0:1, :]
    inv_std = st[1:2, :]
    xt = x_ref[...].astype(jnp.float32)
    o_ref[...] = ((xt - mean) * inv_std).astype(o_ref.dtype)


def pallas_normalize(xp, stats, tile_rows, vmem_limit, alias_input):
    rp, w = xp.shape
    io_alias = {1: 0} if (alias_input and xp.dtype == xp.dtype) else {}
    return pl.pallas_call(
        _normalize_kernel,
        out_shape=jax.ShapeDtypeStruct((rp, w), xp.dtype),
        grid=(_cdiv(rp, tile_rows),),
        in_specs=[
            pl.BlockSpec((2, w), lambda i: (0, 0)),
            pl.BlockSpec((tile_rows, w), lambda i: (i, 0)),
        ],
        out_specs=pl.BlockSpec((tile_rows, w), lambda i: (i, 0)),
        input_output_aliases=io_alias,
        compiler_params=pltpu.CompilerParams(
            dimension_semantics=("parallel",),
            vmem_limit_bytes=vmem_limit,
        ),
    )(stats, xp)


# ----------------------------------------------------------------------------
# Kernel 3 (fused single-pass path): x resident in VMEM, read once; batch
# sums + normalization in one kernel (2 HBM passes instead of 3).
# Chunked with lax.fori_loop so live ranges stay bounded (no vreg spills /
# whole-array f32 copies), which lets the resident size scale with VMEM.
# prior rows (built in the wrapper, lane-tiled):
#   0: prior_sum / safe_count     1: prior_sumsq / safe_count
#   2: std_epsilon                3: gate / safe_count  (broadcast scalar)
# ----------------------------------------------------------------------------
def _fused_kernel(prior_ref, x_ref, o_ref, bsum_ref, bssq_ref, *,
                  hp, pack, chunk):
    rp, w = x_ref.shape
    n_full = rp // chunk
    rem = rp - n_full * chunk

    lane_sum = jnp.zeros((1, w), jnp.float32)
    lane_ssq = jnp.zeros((1, w), jnp.float32)

    if n_full > 0:
        def acc_body(c, carry):
            s, ss = carry
            i = pl.multiple_of(c * chunk, chunk)
            xt = x_ref[pl.ds(i, chunk), :].astype(jnp.float32)
            x3 = xt.reshape(chunk // 8, 8, w)
            return s + jnp.sum(x3, axis=0), ss + jnp.sum(x3 * x3, axis=0)

        zeros8 = jnp.zeros((8, w), jnp.float32)
        s8, ss8 = jax.lax.fori_loop(0, n_full, acc_body, (zeros8, zeros8))
        lane_sum = jnp.sum(s8, axis=0, keepdims=True)
        lane_ssq = jnp.sum(ss8, axis=0, keepdims=True)
    if rem:
        xt = x_ref[pl.ds(n_full * chunk, rem), :].astype(jnp.float32)
        lane_sum = lane_sum + jnp.sum(xt, axis=0, keepdims=True)
        lane_ssq = lane_ssq + jnp.sum(xt * xt, axis=0, keepdims=True)

    bsum_ref[...] = lane_sum
    bssq_ref[...] = lane_ssq

    if pack > 1:
        # Fold packed lanes to per-channel totals replicated in every lane:
        # one tiny MXU matmul with a {0,1} "same channel" matrix (lane-only).
        li = jax.lax.broadcasted_iota(jnp.int32, (w, w), 0)
        lj = jax.lax.broadcasted_iota(jnp.int32, (w, w), 1)
        fold = ((li & (hp - 1)) == (lj & (hp - 1))).astype(jnp.float32)
        ch_sum = jnp.dot(lane_sum, fold, preferred_element_type=jnp.float32)
        ch_ssq = jnp.dot(lane_ssq, fold, preferred_element_type=jnp.float32)
    else:
        ch_sum, ch_ssq = lane_sum, lane_ssq

    prior = prior_ref[...]
    mean = prior[0:1, :] + prior[3:4, :] * ch_sum
    e2 = prior[1:2, :] + prior[3:4, :] * ch_ssq
    var = jnp.maximum(e2 - mean * mean, 0.0)
    std = jnp.maximum(jnp.sqrt(var), prior[2:3, :])
    inv_std = 1.0 / std                                    # tiny (1, W) divide

    if n_full > 0:
        def norm_body(c, carry):
            i = pl.multiple_of(c * chunk, chunk)
            xt = x_ref[pl.ds(i, chunk), :].astype(jnp.float32)
            o_ref[pl.ds(i, chunk), :] = ((xt - mean) * inv_std).astype(o_ref.dtype)
            return carry

        jax.lax.fori_loop(0, n_full, norm_body, 0)
    if rem:
        xt = x_ref[pl.ds(n_full * chunk, rem), :].astype(jnp.float32)
        o_ref[pl.ds(n_full * chunk, rem), :] = (
            (xt - mean) * inv_std).astype(o_ref.dtype)


def pallas_fused_normalize(xp, prior, out_dtype, hp, pack, vmem_limit,
                           alias_input, chunk=1024):
    rp, w = xp.shape
    kernel = functools.partial(_fused_kernel, hp=hp, pack=pack, chunk=chunk)
    io_alias = {1: 0} if (alias_input and xp.dtype == out_dtype) else {}
    return pl.pallas_call(
        kernel,
        out_shape=(
            jax.ShapeDtypeStruct((rp, w), out_dtype),
            jax.ShapeDtypeStruct((1, w), jnp.float32),
            jax.ShapeDtypeStruct((1, w), jnp.float32),
        ),
        in_specs=[
            pl.BlockSpec(memory_space=pltpu.MemorySpace.VMEM),
            pl.BlockSpec(memory_space=pltpu.MemorySpace.VMEM),
        ],
        out_specs=(
            pl.BlockSpec(memory_space=pltpu.MemorySpace.VMEM),
            pl.BlockSpec(memory_space=pltpu.MemorySpace.VMEM),
            pl.BlockSpec(memory_space=pltpu.MemorySpace.VMEM),
        ),
        input_output_aliases=io_alias,
        compiler_params=pltpu.CompilerParams(vmem_limit_bytes=vmem_limit),
    )(prior, xp)


# ----------------------------------------------------------------------------
# Wrapper reproducing Normalizer.forward semantics.  Buffers are carried as an
# explicit state dict (functional equivalent of the registered buffers).
# ----------------------------------------------------------------------------
def normalizer_forward(x, state, *, training=True, tile_rows=8192,
                       fused_max_bytes=None):
    """x: (b, *spatial, h) channels-last.  Returns (normalized_x, new_state)."""
    orig_shape = x.shape
    h = orig_shape[-1]
    x_flat = x.reshape(-1, h)
    n_rows = x_flat.shape[0]

    hp, pack, w = _lane_geometry(h)

    count = state["count"].astype(jnp.float32)
    run_sum = state["sum"].astype(jnp.float32)
    run_sumsq = state["sum_squared"].astype(jnp.float32)
    eps = state["std_epsilon"].astype(jnp.float32)
    n_acc = state["n_accumulations"].astype(jnp.float32)
    max_acc = state["max_accumulations"].astype(jnp.float32)

    if hp != h:  # channel pad only when the lane geometry requires it
        x_flat = jnp.pad(x_flat, ((0, 0), (0, hp - h)))

    xp, rp = _to_packed(x_flat, pack, w)
    # True iff xp is a freshly materialized buffer (pad happened) -> safe to
    # alias its HBM buffer onto the kernel output, and the final slice is real.
    xp_fresh = (hp != h) or (rp * pack != n_rows)

    if training:
        gate = (n_acc < max_acc).astype(jnp.float32)
    else:
        gate = jnp.float32(0.0)

    new_count = count + gate * jnp.float32(n_rows)
    safe_count = jnp.maximum(new_count, jnp.float32(1.0))

    def pad_ch(v, fill=0.0):
        return jnp.pad(v, (0, hp - h), constant_values=fill) if hp != h else v

    eps_p = pad_ch(eps, 1.0)   # padded channels get std 1 -> clean zeros out

    # Generation-aware budgets.
    vmem_cap = _device_vmem_bytes()
    if fused_max_bytes is None:
        fused_max_bytes = vmem_cap // 4     # ~32 MiB on v5e/v6e, ~16 MiB on v7x
    stream_vmem = 64 * MIB if vmem_cap >= 128 * MIB else 48 * MIB

    itemsize = jnp.dtype(x.dtype).itemsize
    packed_bytes = rp * w * itemsize
    use_fused = training and packed_bytes <= fused_max_bytes

    zeros_h = jnp.zeros((h,), jnp.float32)

    if use_fused:
        # Single pass over HBM: x read once, sums + normalization fused.
        inv_safe = 1.0 / safe_count
        prior = jnp.stack([
            jnp.tile(pad_ch(run_sum) * inv_safe, pack),
            jnp.tile(pad_ch(run_sumsq) * inv_safe, pack),
            jnp.tile(eps_p, pack),
            jnp.full((w,), gate * inv_safe, jnp.float32),
        ]).astype(jnp.float32)
        fused_vmem = max(32 * MIB, 2 * packed_bytes + 16 * MIB)
        fused_vmem = min(fused_vmem, max(32 * MIB, vmem_cap - 8 * MIB))
        y_packed, bsum_lane, bssq_lane = pallas_fused_normalize(
            xp, prior, x.dtype, hp, pack, fused_vmem, alias_input=xp_fresh)
        batch_sum = bsum_lane.reshape(pack, hp).sum(axis=0)[:h]
        batch_ssq = bssq_lane.reshape(pack, hp).sum(axis=0)[:h]
    else:
        # Two-pass tiled path (large inputs / eval mode).
        tr, n_splits, tiles_per_split = _choose_row_tiling(rp, w, tile_rows)
        if training:
            # Skip the whole reduction HBM pass once accumulation saturates.
            def _run_acc(xp_):
                s_p, ss_p = pallas_accumulate(xp_, tr, n_splits,
                                              tiles_per_split, stream_vmem)
                bs = (s_p.reshape(-1, w).sum(axis=0)
                      .reshape(pack, hp).sum(axis=0)[:h])
                bq = (ss_p.reshape(-1, w).sum(axis=0)
                      .reshape(pack, hp).sum(axis=0)[:h])
                return bs, bq

            batch_sum, batch_ssq = jax.lax.cond(
                gate > 0.0, _run_acc, lambda _: (zeros_h, zeros_h), xp)
        else:
            batch_sum, batch_ssq = zeros_h, zeros_h

        tot_sum = run_sum + gate * batch_sum
        tot_ssq = run_sumsq + gate * batch_ssq
        mean = tot_sum / safe_count
        var = jnp.maximum(tot_ssq / safe_count - mean * mean, 0.0)
        std = jnp.maximum(jnp.sqrt(var), eps)
        inv_std = 1.0 / std
        stats = jnp.stack([jnp.tile(pad_ch(mean), pack),
                           jnp.tile(pad_ch(inv_std, 1.0), pack)])
        y_packed = pallas_normalize(xp, stats, tr, stream_vmem,
                                    alias_input=xp_fresh)

    # Unpack rows/channels back to the original channels-last layout.
    # (Bitcast reshapes; the slice only materializes when padding occurred.)
    y_flat = y_packed.reshape(rp * pack, hp)
    if xp_fresh:
        y_flat = y_flat[:n_rows, :h]
    y = y_flat.reshape(orig_shape)

    new_state = dict(state)
    new_state.update(
        count=new_count,
        sum=run_sum + gate * batch_sum,
        sum_squared=run_sumsq + gate * batch_ssq,
        n_accumulations=n_acc + gate,
    )
    return y, new_state


def init_normalizer_state(size, max_accumulations=10**6, std_epsilon=1e-8):
    h = size[0] if isinstance(size, (tuple, list)) else size
    return {
        "max_accumulations": jnp.float32(max_accumulations),
        "count": jnp.float32(0.0),
        "n_accumulations": jnp.float32(0.0),
        "sum": jnp.zeros((h,), jnp.float32),
        "sum_squared": jnp.zeros((h,), jnp.float32),
        "std_epsilon": jnp.full((h,), std_epsilon, jnp.float32),
    }


# ----------------------------------------------------------------------------
# Pure-JAX reference mirroring the PyTorch code path.
# ----------------------------------------------------------------------------
def reference_forward(x, state, training=True):
    h = x.shape[-1]
    xf = x.reshape(-1, h).astype(jnp.float32)
    s = state["sum"].astype(jnp.float32)
    ss = state["sum_squared"].astype(jnp.float32)
    cnt = state["count"].astype(jnp.float32)
    if training and float(state["n_accumulations"]) < float(
            state["max_accumulations"]):
        s = s + xf.sum(0)
        ss = ss + (xf ** 2).sum(0)
        cnt = cnt + xf.shape[0]
    safe = jnp.maximum(cnt, 1.0)
    mean = s / safe
    std = jnp.maximum(jnp.sqrt(ss / safe - mean ** 2), state["std_epsilon"])
    return ((xf - mean) / std).reshape(x.shape).astype(x.dtype)


if __name__ == "__main__":
    key = jax.random.PRNGKey(0)
    k1, k2, k3 = jax.random.split(key, 3)

    # ---- case 1: small aligned input -> fused single-pass path (jit) ------
    B, M, N, H = 2, 16, 16, 4
    x1 = jax.random.normal(k1, (B, M, N, H), dtype=jnp.float32) * 3.0 + 1.5
    st0 = init_normalizer_state((H,))

    fwd = jax.jit(functools.partial(normalizer_forward, training=True))
    y1, st1 = fwd(x1, st0)
    jax.block_until_ready(y1)
    y1_ref = reference_forward(x1, st0)
    assert y1.shape == x1.shape
    assert jnp.allclose(y1, y1_ref, atol=1e-4, rtol=1e-4), "case1 mismatch"
    assert abs(float(st1["count"]) - B * M * N) < 1e-3
    assert abs(float(st1["n_accumulations"]) - 1.0) < 1e-3

    # second call chains the running statistics
    y1b, st2 = fwd(x1, st1)
    y1b_ref = reference_forward(x1, st1)
    assert jnp.allclose(jax.block_until_ready(y1b), y1b_ref,
                        atol=1e-4, rtol=1e-4), "case1 chained mismatch"

    # ---- case 2: odd channel count -> two-pass tiled path (jit, lax.cond) --
    B2, M2, N2, H2 = 2, 32, 48, 5
    x2 = jax.random.normal(k2, (B2, M2, N2, H2), dtype=jnp.float32) * 0.7 - 2.0
    st0b = init_normalizer_state((H2,))
    fwd2 = jax.jit(functools.partial(normalizer_forward, training=True,
                                     fused_max_bytes=0))
    y2, st3 = fwd2(x2, st0b)
    jax.block_until_ready(y2)
    y2_ref = reference_forward(x2, st0b)
    assert y2.shape == x2.shape
    assert jnp.allclose(y2, y2_ref, atol=1e-4, rtol=1e-4), "case2 mismatch"

    # saturated accumulation: the lax.cond skips the reduction HBM pass
    st_sat = dict(st3)
    st_sat["n_accumulations"] = st3["max_accumulations"]
    y2s, st5 = fwd2(x2, st_sat)
    jax.block_until_ready(y2s)
    y2s_ref = reference_forward(x2, st_sat)
    assert jnp.allclose(y2s, y2s_ref, atol=1e-4, rtol=1e-4), "saturated mismatch"
    assert abs(float(st5["count"]) - float(st_sat["count"])) < 1e-3

    # eval mode (no accumulation) uses the plain normalize kernel only
    y3, st4 = normalizer_forward(x2, st3, training=False, fused_max_bytes=0)
    jax.block_until_ready(y3)
    y3_ref = reference_forward(x2, st3, training=False)
    assert jnp.allclose(y3, y3_ref, atol=1e-4, rtol=1e-4), "eval mismatch"
    assert abs(float(st4["count"]) - float(st3["count"])) < 1e-3

    # ---- case 3: ragged row count (n_rows % pack != 0), both paths --------
    B3, M3, N3, H3 = 2, 10, 10, 4
    x3 = jax.random.normal(k3, (B3, M3, N3, H3), dtype=jnp.float32) + 0.25
    st0c = init_normalizer_state((H3,))
    y4, _ = normalizer_forward(x3, st0c, training=True)               # fused
    y5, _ = normalizer_forward(x3, st0c, training=True, fused_max_bytes=0)
    jax.block_until_ready((y4, y5))
    y4_ref = reference_forward(x3, st0c)
    assert jnp.allclose(y4, y4_ref, atol=1e-4, rtol=1e-4), "ragged fused mismatch"
    assert jnp.allclose(y5, y4_ref, atol=1e-4, rtol=1e-4), "ragged tiled mismatch"

    print("KERNEL_OK")
</pallas_src>

<mosaic_0001>
module attributes {stable_mosaic.version = 11 : i64} {
  func.func @_fused_kernel(%arg0: memref<4x128xf32, #tpu.memory_space<vmem>>, %arg1: memref<16x128xf32, #tpu.memory_space<vmem>>, %arg2: memref<16x128xf32, #tpu.memory_space<vmem>>, %arg3: memref<1x128xf32, #tpu.memory_space<vmem>>, %arg4: memref<1x128xf32, #tpu.memory_space<vmem>>) attributes {dimension_semantics = [], scalar_prefetch = 0 : i64, scratch_operands = 0 : i64, tpu.core_type = #tpu.core_type<tc>} {
    %cst = arith.constant 0.000000e+00 : f32
    %0 = vector.broadcast %cst : f32 to vector<1x128xf32>
    %cst_0 = arith.constant 0.000000e+00 : f32
    %1 = vector.broadcast %cst_0 : f32 to vector<1x128xf32>
    %c0 = arith.constant 0 : index
    %c0_1 = arith.constant 0 : index
    %2 = vector.load %arg1[%c0, %c0_1] : memref<16x128xf32, #tpu.memory_space<vmem>>, vector<16x128xf32>
    %cst_2 = arith.constant dense<0.000000e+00> : vector<128xf32>
    %3 = vector.multi_reduction <add>, %2, %cst_2 [0] : vector<16x128xf32> to vector<128xf32>
    %4 = vector.shape_cast %3 : vector<128xf32> to vector<1x128xf32>
    %5 = arith.addf %0, %4 : vector<1x128xf32>
    %6 = arith.mulf %2, %2 : vector<16x128xf32>
    %cst_3 = arith.constant dense<0.000000e+00> : vector<128xf32>
    %7 = vector.multi_reduction <add>, %6, %cst_3 [0] : vector<16x128xf32> to vector<128xf32>
    %8 = vector.shape_cast %7 : vector<128xf32> to vector<1x128xf32>
    %9 = arith.addf %1, %8 : vector<1x128xf32>
    %c0_4 = arith.constant 0 : index
    %c0_5 = arith.constant 0 : index
    %10 = vector.load %arg3[%c0_4, %c0_5] : memref<1x128xf32, #tpu.memory_space<vmem>>, vector<1x128xf32>
    tpu.vector_store %arg3[%c0_4, %c0_5], %5 {strides = array<i32>} : memref<1x128xf32, #tpu.memory_space<vmem>>, vector<1x128xf32>,
    %c0_6 = arith.constant 0 : index
    %c0_7 = arith.constant 0 : index
    %11 = vector.load %arg4[%c0_6, %c0_7] : memref<1x128xf32, #tpu.memory_space<vmem>>, vector<1x128xf32>
    tpu.vector_store %arg4[%c0_6, %c0_7], %9 {strides = array<i32>} : memref<1x128xf32, #tpu.memory_space<vmem>>, vector<1x128xf32>,
    %12 = tpu.iota {dimensions = array<i32: 0>} : vector<128x128xi32>
    %13 = tpu.iota {dimensions = array<i32: 1>} : vector<128x128xi32>
    %c3_i32 = arith.constant 3 : i32
    %14 = vector.broadcast %c3_i32 : i32 to vector<128x128xi32>
    %15 = arith.andi %12, %14 : vector<128x128xi32>
    %c3_i32_8 = arith.constant 3 : i32
    %16 = vector.broadcast %c3_i32_8 : i32 to vector<128x128xi32>
    %17 = arith.andi %13, %16 : vector<128x128xi32>
    %18 = arith.cmpi eq, %15, %17 : vector<128x128xi32>
    %19 = arith.extui %18 : vector<128x128xi1> to vector<128x128xi32>
    %20 = arith.sitofp %19 : vector<128x128xi32> to vector<128x128xf32>
    %cst_9 = arith.constant dense<0.000000e+00> : vector<1x128xf32>
    %21 = tpu.matmul %5, %20, %cst_9 {dimension_numbers = #tpu.dot_dimension_numbers<[1], [0], [0], [1], [0, 0, 1, 1], [], []>} : vector<1x128xf32>, vector<128x128xf32>, vector<1x128xf32> -> vector<1x128xf32>
    %cst_10 = arith.constant dense<0.000000e+00> : vector<1x128xf32>
    %22 = tpu.matmul %9, %20, %cst_10 {dimension_numbers = #tpu.dot_dimension_numbers<[1], [0], [0], [1], [0, 0, 1, 1], [], []>} : vector<1x128xf32>, vector<128x128xf32>, vector<1x128xf32> -> vector<1x128xf32>
    %c0_11 = arith.constant 0 : index
    %c0_12 = arith.constant 0 : index
    %23 = vector.load %arg0[%c0_11, %c0_12] : memref<4x128xf32, #tpu.memory_space<vmem>>, vector<4x128xf32>
    %24 = vector.extract_strided_slice %23 {offsets = [0, 0], sizes = [1, 128], strides = [1, 1]} : vector<4x128xf32> to vector<1x128xf32>
    %25 = vector.extract_strided_slice %23 {offsets = [3, 0], sizes = [1, 128], strides = [1, 1]} : vector<4x128xf32> to vector<1x128xf32>
    %26 = arith.mulf %25, %21 : vector<1x128xf32>
    %27 = arith.addf %24, %26 : vector<1x128xf32>
    %28 = vector.extract_strided_slice %23 {offsets = [1, 0], sizes = [1, 128], strides = [1, 1]} : vector<4x128xf32> to vector<1x128xf32>
    %29 = vector.extract_strided_slice %23 {offsets = [3, 0], sizes = [1, 128], strides = [1, 1]} : vector<4x128xf32> to vector<1x128xf32>
    %30 = arith.mulf %29, %22 : vector<1x128xf32>
    %31 = arith.addf %28, %30 : vector<1x128xf32>
    %32 = arith.mulf %27, %27 : vector<1x128xf32>
    %33 = arith.subf %31, %32 : vector<1x128xf32>
    %cst_13 = arith.constant 0.000000e+00 : f32
    %34 = vector.broadcast %cst_13 : f32 to vector<1x128xf32>
    %35 = arith.maximumf %33, %34 : vector<1x128xf32>
    %36 = math.sqrt %35 : vector<1x128xf32>
    %37 = vector.extract_strided_slice %23 {offsets = [2, 0], sizes = [1, 128], strides = [1, 1]} : vector<4x128xf32> to vector<1x128xf32>
    %38 = arith.maximumf %36, %37 : vector<1x128xf32>
    %cst_14 = arith.constant 1.000000e+00 : f32
    %39 = vector.broadcast %cst_14 : f32 to vector<1x128xf32>
    %40 = arith.divf %39, %38 : vector<1x128xf32>
    %c0_15 = arith.constant 0 : index
    %c0_16 = arith.constant 0 : index
    %41 = vector.load %arg1[%c0_15, %c0_16] : memref<16x128xf32, #tpu.memory_space<vmem>>, vector<16x128xf32>
    %42 = vector.broadcast %27 : vector<1x128xf32> to vector<16x128xf32>
    %43 = arith.subf %41, %42 : vector<16x128xf32>
    %44 = vector.broadcast %40 : vector<1x128xf32> to vector<16x128xf32>
    %45 = arith.mulf %43, %44 : vector<16x128xf32>
    %c0_17 = arith.constant 0 : index
    %c0_18 = arith.constant 0 : index
    %46 = vector.load %arg2[%c0_17, %c0_18] : memref<16x128xf32, #tpu.memory_space<vmem>>, vector<16x128xf32>
    tpu.vector_store %arg2[%c0_17, %c0_18], %45 {strides = array<i32>} : memref<16x128xf32, #tpu.memory_space<vmem>>, vector<16x128xf32>,
    return
  }
}

</mosaic_0001>

<bundles_post_ra>
// kernel: tile.22
= control target key start
LH: loop header
LB: loop body
LE: loop exit
PB: predicated region body
PF: predicated region fallthrough
CT: control target
= control target key end

     0   :  { %s40_s0 = inlined_call_operand.vmem [shape: f32[4], index: 0, kind: input, shape index: {}]   ;;  %s41_s1 = inlined_call_operand.vmem [shape: f32[32,4], index: 1, kind: output, shape index: {}]  }
   0x1   :  { %v4_v0 = vld [vmem:[%s40_s0] ss:$0 sm:$0xff] }
   0x2   :  { %5 = vst [vmem:[%s41_s1] sm:$0xff] %v4_v0  ;;  %12 = vst [vmem:[%s41_s1 + $0x8] sm:$0xff] %v4_v0 }
   0x3   :  { %13 = vst [vmem:[%s41_s1 + $0x10] sm:$0xff] %v4_v0  ;;  %14 = vst [vmem:[%s41_s1 + $0x18] sm:$0xff] %v4_v0 }

// kernel: tile.28
= control target key start
LH: loop header
LB: loop body
LE: loop exit
PB: predicated region body
PF: predicated region fallthrough
CT: control target
= control target key end

     0   :  { %s259_s10 = smov 124   ;;  %s260_s11 = smov 116   ;;  %vm3_vm0 = vcmask 31744   ;;  %vm9_vm1 = vcmask 1048544   ;;  %vm15_vm2 = vcmask 1015744   ;;  %vm21_vm3 = vcmask 982944   ;;  %s399_s0 = inlined_call_operand.vmem [shape: f32[32,4], index: 0, kind: input, shape index: {}]   ;;  %s400_s1 = inlined_call_operand.vmem [shape: f32[1,128], index: 1, kind: output, shape index: {}]  }
   0x1   :  { %v197_v0 = vld [vmem:[%s399_s0 + $0x1f] sm:$0x1]   ;;  %v199_v1 = vld [vmem:[%s399_s0 + $0x1d] sm:$0x1]   ;;  %v198_v2 = vld [vmem:[%s399_s0 + $0x1e] sm:$0x1]  }
   0x2   :  { %7 = vrot.lane.b32.xlu0 %v197_v0, %s259_s10  ;;  %19 = vrot.lane.b32.xlu1 %v199_v1, %s260_s11  ;;  %v200_v3 = vld [vmem:[%s399_s0 + $0x1c] sm:$0x1]   ;;  %s261_s16 = smov 120   ;;  %s262_s17 = smov 112   ;;  %v201_v4 = vld [vmem:[%s399_s0 + $0x1b] sm:$0x1]  }
   0x3   :  { %v202_v5 = vld [vmem:[%s399_s0 + $0x1a] sm:$0x1]   ;;  %s263_s22 = smov 108   ;;  %s264_s23 = smov 104   ;;  %v203_v6 = vld [vmem:[%s399_s0 + $0x19] sm:$0x1]  }
   0x4   :  { %v204_v7 = vld [vmem:[%s399_s0 + $0x18] sm:$0x1]   ;;  %s265_s28 = smov 100   ;;  %s266_s29 = smov 96   ;;  %v205_v8 = vld [vmem:[%s399_s0 + $0x17] sm:$0x1]  }
   0x5   :  { %v206_v9 = vld [vmem:[%s399_s0 + $0x16] sm:$0x1]   ;;  %v2_v10 = vld [vmem:[%s399_s0] sm:$0x1]   ;;  %s267_s7 = smov 92   ;;  %s268_s8 = smov 88  }
   0x6   :  { %13 = vrot.lane.b32.xlu0 %v198_v2, %s261_s16  ;;  %25 = vrot.lane.b32.xlu1 %v200_v3, %s262_s17  ;;  %4 = vst.msk [vmem:[#allocation0] sm:$0x1] %vm3_vm0, %v2_v10   ;;  %v207_v11 = vld [vmem:[%s399_s0 + $0x15] sm:$0x1]   ;;  %v208_v12 = vld [vmem:[%s399_s0 + $0x14] sm:$0x1]  }
   0x7   :  { %s269_s13 = smov 84   ;;  %s270_s14 = smov 80   ;;  %v209_v13 = vld [vmem:[%s399_s0 + $0x13] sm:$0x1]   ;;  %v210_v14 = vld [vmem:[%s399_s0 + $0x12] sm:$0x1]  }
   0x8   :  { %s271_s19 = smov 76   ;;  %s272_s20 = smov 72   ;;  %v211_v15 = vld [vmem:[%s399_s0 + $0x11] sm:$0x1]   ;;  %v212_v16 = vld [vmem:[%s399_s0 + $0x10] sm:$0x1]  }
   0x9   :  { %s273_s25 = smov 68   ;;  %s274_s26 = smov 64   ;;  %v213_v17 = vld [vmem:[%s399_s0 + $0xf] sm:$0x1]   ;;  %v214_v18 = vld [vmem:[%s399_s0 + $0xe] sm:$0x1]  }
   0xa   :  { %31 = vrot.lane.b32.xlu0 %v201_v4, %s263_s22  ;;  %37 = vrot.lane.b32.xlu1 %v202_v5, %s264_s23  ;;  %s275_s2 = smov 60   ;;  %s276_s3 = smov 56   ;;  %v215_v19 = vld [vmem:[%s399_s0 + $0xd] sm:$0x1]   ;;  %v216_v20 = vld [vmem:[%s399_s0 + $0xc] sm:$0x1]  }
   0xb   :  { %s278_s9 = smov 48   ;;  %v217_v21 = vld [vmem:[%s399_s0 + $0xb] sm:$0x1]   ;;  %v218_v22 = vld [vmem:[%s399_s0 + $0xa] sm:$0x1]   ;;  %s280_s15 = smov 40  }
   0xc   :  { %v219_v23 = vld [vmem:[%s399_s0 + $0x9] sm:$0x1]   ;;  %v220_v24 = vld [vmem:[%s399_s0 + $0x8] sm:$0x1]   ;;  %s282_s21 = smov 32   ;;  %s284_s27 = smov 24  }
   0xd   :  { %v221_v25 = vld [vmem:[%s399_s0 + $0x7] sm:$0x1]   ;;  %v222_v26 = vld [vmem:[%s399_s0 + $0x6] sm:$0x1]   ;;  %v223_v27 = vld [vmem:[%s399_s0 + $0x5] sm:$0x1]  }
   0xe   :  { %43 = vrot.lane.b32.xlu0 %v203_v6, %s265_s28  ;;  %49 = vrot.lane.b32.xlu1 %v204_v7, %s266_s29  ;;  %v224_v28 = vld [vmem:[%s399_s0 + $0x4] sm:$0x1]   ;;  %s286_s4 = smov 16   ;;  %v225_v29 = vld [vmem:[%s399_s0 + $0x3] sm:$0x1]   ;;  %s288_s10 = smov 8  }
   0xf   :  { %v226_v30 = vld [vmem:[%s399_s0 + $0x2] sm:$0x1]   ;;  %v227_v31 = vld [vmem:[%s399_s0 + $0x1] sm:$0x1]   ;;  %s289_s0 = smov 4   ;;  %vm27_vm4 = vcmask 950144  }
  0x10   :  { %vm33_vm5 = vcmask 917344   ;;  %vm39_vm6 = vcmask 884544   ;;  %vm45_vm7 = vcmask 851744   ;;  %vm51_vm8 = vcmask 818944  }
  0x11   :  { %vm57_vm9 = vcmask 786144   ;;  %vm63_vm10 = vcmask 753344   ;;  %vm69_vm11 = vcmask 720544   ;;  %vm75_vm12 = vcmask 687744  }
  0x12   :  { %55 = vrot.lane.b32.xlu0 %v205_v8, %s267_s7  ;;  %61 = vrot.lane.b32.xlu1 %v206_v9, %s268_s8  ;;  %s277_s8 = smov 52   ;;  %vm81_vm13 = vcmask 654944   ;;  %vm87_vm14 = vcmask 622144   ;;  %vm93_vm15 = vcmask 589344   ;;  %vm99_vm0 = vcmask 556544  }
  0x16   :  { %67 = vrot.lane.b32.xlu0 %v207_v11, %s269_s13  ;;  %73 = vrot.lane.b32.xlu1 %v208_v12, %s270_s14  ;;  %s279_s14 = smov 44  }
  0x1a   :  { %79 = vrot.lane.b32.xlu0 %v209_v13, %s271_s19  ;;  %85 = vrot.lane.b32.xlu1 %v210_v14, %s272_s20  ;;  %s281_s20 = smov 36  }
  0x1e   :  { %91 = vrot.lane.b32.xlu0 %v211_v15, %s273_s25  ;;  %97 = vrot.lane.b32.xlu1 %v212_v16, %s274_s26  ;;  %s283_s26 = smov 28  }
  0x22   :  { %103 = vrot.lane.b32.xlu0 %v213_v17, %s275_s2  ;;  %109 = vrot.lane.b32.xlu1 %v214_v18, %s276_s3  ;;  %s285_s3 = smov 20  }
  0x26   :  { %115 = vrot.lane.b32.xlu0 %v215_v19, %s277_s8  ;;  %121 = vrot.lane.b32.xlu1 %v216_v20, %s278_s9  ;;  %s287_s9 = smov 12  }
  0x2a   :  { %127 = vrot.lane.b32.xlu0 %v217_v21, %s279_s14  ;;  %133 = vrot.lane.b32.xlu1 %v218_v22, %s280_s15 }
  0x2e   :  { %139 = vrot.lane.b32.xlu0 %v219_v23, %s281_s20  ;;  %145 = vrot.lane.b32.xlu1 %v220_v24, %s282_s21 }
  0x32   :  { %151 = vrot.lane.b32.xlu0 %v221_v25, %s283_s26  ;;  %157 = vrot.lane.b32.xlu1 %v222_v26, %s284_s27 }
  0x36   :  { %163 = vrot.lane.b32.xlu0 %v223_v27, %s285_s3  ;;  %169 = vrot.lane.b32.xlu1 %v224_v28, %s286_s4 }
  0x3a   :  { %175 = vrot.lane.b32.xlu0 %v225_v29, %s287_s9  ;;  %181 = vrot.lane.b32.xlu1 %v226_v30, %s288_s10 }
  0x3e   :  { %187 = vrot.lane.b32.xlu0 %v227_v31, %s289_s0 }
  0x74   :  { %v8_v32 = vpop.permute.xlu0 %7   ;;  %v20_v33 = vpop.permute.xlu1 %19  }
  0x75   :  { %10 = vst.msk [vmem:[#allocation0] sm:$0x1] %vm9_vm1, %v8_v32   ;;  %vm105_vm1 = vcmask 523744  }
  0x78   :  { %v14_v34 = vpop.permute.xlu0 %13   ;;  %v26_v35 = vpop.permute.xlu1 %25  }
  0x79   :  { %16 = vst.msk [vmem:[#allocation0] sm:$0x1] %vm15_vm2, %v14_v34   ;;  %vm111_vm2 = vcmask 490944  }
  0x7a   :  { %22 = vst.msk [vmem:[#allocation0] sm:$0x1] %vm21_vm3, %v20_v33   ;;  %vm117_vm3 = vcmask 458144  }
  0x7b   :  { %28 = vst.msk [vmem:[#allocation0] sm:$0x1] %vm27_vm4, %v26_v35   ;;  %vm123_vm4 = vcmask 425344  }
  0x7c   :  { %v32_v36 = vpop.permute.xlu0 %31   ;;  %v38_v37 = vpop.permute.xlu1 %37  }
  0x7d   :  { %34 = vst.msk [vmem:[#allocation0] sm:$0x1] %vm33_vm5, %v32_v36   ;;  %vm129_vm5 = vcmask 392544  }
  0x7e   :  { %40 = vst.msk [vmem:[#allocation0] sm:$0x1] %vm39_vm6, %v38_v37   ;;  %vm135_vm6 = vcmask 359744  }
  0x80   :  { %v44_v38 = vpop.permute.xlu0 %43   ;;  %v50_v39 = vpop.permute.xlu1 %49  }
  0x81   :  { %46 = vst.msk [vmem:[#allocation0] sm:$0x1] %vm45_vm7, %v44_v38   ;;  %vm141_vm7 = vcmask 326944  }
  0x82   :  { %52 = vst.msk [vmem:[#allocation0] sm:$0x1] %vm51_vm8, %v50_v39   ;;  %vm147_vm8 = vcmask 294144  }
  0x84   :  { %v56_v40 = vpop.permute.xlu0 %55   ;;  %v62_v41 = vpop.permute.xlu1 %61  }
  0x85   :  { %58 = vst.msk [vmem:[#allocation0] sm:$0x1] %vm57_vm9, %v56_v40   ;;  %vm153_vm9 = vcmask 261344  }
  0x86   :  { %64 = vst.msk [vmem:[#allocation0] sm:$0x1] %vm63_vm10, %v62_v41   ;;  %vm159_vm10 = vcmask 228544  }
  0x88   :  { %v68_v42 = vpop.permute.xlu0 %67   ;;  %v74_v43 = vpop.permute.xlu1 %73  }
  0x89   :  { %70 = vst.msk [vmem:[#allocation0] sm:$0x1] %vm69_vm11, %v68_v42   ;;  %vm165_vm11 = vcmask 195744  }
  0x8a   :  { %76 = vst.msk [vmem:[#allocation0] sm:$0x1] %vm75_vm12, %v74_v43   ;;  %vm171_vm12 = vcmask 162944  }
  0x8c   :  { %v80_v44 = vpop.permute.xlu0 %79   ;;  %v86_v45 = vpop.permute.xlu1 %85  }
  0x8d   :  { %82 = vst.msk [vmem:[#allocation0] sm:$0x1] %vm81_vm13, %v80_v44   ;;  %vm177_vm13 = vcmask 130144  }
  0x8e   :  { %88 = vst.msk [vmem:[#allocation0] sm:$0x1] %vm87_vm14, %v86_v45   ;;  %vm183_vm14 = vcmask 97344  }
  0x90   :  { %v92_v46 = vpop.permute.xlu0 %91   ;;  %v98_v47 = vpop.permute.xlu1 %97  }
  0x91   :  { %94 = vst.msk [vmem:[#allocation0] sm:$0x1] %vm93_vm15, %v92_v46   ;;  %vm189_vm15 = vcmask 64544  }
  0x92   :  { %100 = vst.msk [vmem:[#allocation0] sm:$0x1] %vm99_vm0, %v98_v47  }
  0x94   :  { %v104_v48 = vpop.permute.xlu0 %103   ;;  %v110_v49 = vpop.permute.xlu1 %109  }
  0x95   :  { %106 = vst.msk [vmem:[#allocation0] sm:$0x1] %vm105_vm1, %v104_v48  }
  0x96   :  { %112 = vst.msk [vmem:[#allocation0] sm:$0x1] %vm111_vm2, %v110_v49  }
  0x98   :  { %v116_v50 = vpop.permute.xlu0 %115   ;;  %v122_v51 = vpop.permute.xlu1 %121  }
  0x99   :  { %118 = vst.msk [vmem:[#allocation0] sm:$0x1] %vm117_vm3, %v116_v50  }
  0x9a   :  { %124 = vst.msk [vmem:[#allocation0] sm:$0x1] %vm123_vm4, %v122_v51  }
  0x9c   :  { %v128_v52 = vpop.permute.xlu0 %127   ;;  %v134_v53 = vpop.permute.xlu1 %133  }
  0x9d   :  { %130 = vst.msk [vmem:[#allocation0] sm:$0x1] %vm129_vm5, %v128_v52  }
  0x9e   :  { %136 = vst.msk [vmem:[#allocation0] sm:$0x1] %vm135_vm6, %v134_v53  }
  0xa0   :  { %v140_v54 = vpop.permute.xlu0 %139   ;;  %v146_v55 = vpop.permute.xlu1 %145  }
  0xa1   :  { %142 = vst.msk [vmem:[#allocation0] sm:$0x1] %vm141_vm7, %v140_v54  }
  0xa2   :  { %148 = vst.msk [vmem:[#allocation0] sm:$0x1] %vm147_vm8, %v146_v55  }
  0xa4   :  { %v152_v56 = vpop.permute.xlu0 %151   ;;  %v158_v57 = vpop.permute.xlu1 %157  }
  0xa5   :  { %154 = vst.msk [vmem:[#allocation0] sm:$0x1] %vm153_vm9, %v152_v56  }
  0xa6   :  { %160 = vst.msk [vmem:[#allocation0] sm:$0x1] %vm159_vm10, %v158_v57  }
  0xa8   :  { %v164_v58 = vpop.permute.xlu0 %163   ;;  %v170_v59 = vpop.permute.xlu1 %169  }
  0xa9   :  { %166 = vst.msk [vmem:[#allocation0] sm:$0x1] %vm165_vm11, %v164_v58  }
  0xaa   :  { %172 = vst.msk [vmem:[#allocation0] sm:$0x1] %vm171_vm12, %v170_v59  }
  0xac   :  { %v176_v60 = vpop.permute.xlu0 %175   ;;  %v182_v61 = vpop.permute.xlu1 %181  }
  0xad   :  { %178 = vst.msk [vmem:[#allocation0] sm:$0x1] %vm177_vm13, %v176_v60  }
  0xae   :  { %184 = vst.msk [vmem:[#allocation0] sm:$0x1] %vm183_vm14, %v182_v61  }
  0xb0   :  { %v188_v62 = vpop.permute.xlu0 %187  }
  0xb1   :  { %190 = vst.msk [vmem:[#allocation0] sm:$0x1] %vm189_vm15, %v188_v62  }
  0xb8   :  { %v194_v63 = vld [vmem:[#allocation0] sm:$0x1] }
  0xb9   :  { %196 = vst [vmem:[%s400_s1] sm:$0x1] %v194_v63 }

// kernel: normalizer_forward.1
= control target key start
LH: loop header
LB: loop body
LE: loop exit
PB: predicated region body
PF: predicated region fallthrough
CT: control target
= control target key end

     0   :  { %v36_v0 = vlaneseq  ;;  %v532_v1 = vmov 0.0|0.0   ;;  %vm533_vm0 = vmmov 0   ;;  %v534_v4 = vmov 0.0   ;;  %s730_s1 = inlined_call_operand.vmem [shape: f32[16,128], index: 1, kind: input, shape index: {}]   ;;  %s731_s3 = inlined_call_operand.vmem [shape: f32[1,128], index: 3, kind: output, shape index: {1}]   ;;  %s732_s4 = inlined_call_operand.vmem [shape: f32[1,128], index: 4, kind: output, shape index: {2}]   ;;  %s733_s0 = inlined_call_operand.vmem [shape: f32[4,128], index: 0, kind: input, shape index: {}]   ;;  %s734_s2 = inlined_call_operand.vmem [shape: f32[16,128], index: 2, kind: output, shape index: {0}]  }
   0x1   :  { %476 = vmatprep.subr.bf16.mxu0 %v532_v1  ;;  %500 = vmatprep.subr.bf16.mxu1 %v532_v1  ;;  %v583_v18 = vld [vmem:[%s730_s1] sm:$0xff]  ;;  %v588_v19 = vld [vmem:[%s730_s1 + $0x8] sm:$0xff]  ;;  %v535_v24 = vmov 1.0|1.0  }
   0x2   :  { %v563_v2 = vshrl.u32 %v36_v0, 7  ;;  %v54_v3 = vand.u32 127, %v36_v0  ;;  %438 = vmatprep.mubr.msk.f32.mxu0 %vm533_vm0, %v534_v4  ;;  %473 = vmatprep.mubr.msk.f32.mxu1 %vm533_vm0, %v534_v4  ;;  %v16_v25 = vadd.f32 %v588_v19, %v583_v18  ;;  %v24_v29 = vmul.f32 %v583_v18, %v583_v18 }
   0x3   :  { %v25_v33 = vmul.f32 %v588_v19, %v588_v19 }
   0x4   :  { %v38_v5 = vadd.s32 8, %v563_v2  ;;  %v55_v6 = vand.u32 3, %v563_v2  ;;  %v567_v7 = vand.u32 3, %v54_v3  ;;  %v39_v8 = vadd.s32 16, %v563_v2 }
   0x5   :  { %v40_v9 = vadd.s32 24, %v563_v2  ;;  %v41_v10 = vadd.s32 32, %v563_v2  ;;  %v42_v11 = vadd.s32 40, %v563_v2  ;;  %v43_v16 = vadd.s32 48, %v563_v2 }
   0x6   :  { %v56_v12 = vand.u32 3, %v38_v5  ;;  %vm574_vm1 = vcmp.eq.s32.totalorder %v55_v6, %v567_v7  ;;  %v57_v14 = vand.u32 3, %v39_v8  ;;  %v44_v17 = vadd.s32 56, %v563_v2  ;;  %v260_v6 = vld [vmem:[%s733_s0] sm:$0xf] }
   0x7   :  { %v58_v15 = vand.u32 3, %v40_v9  ;;  %v59_v21 = vand.u32 3, %v41_v10  ;;  %v60_v22 = vand.u32 3, %v42_v11  ;;  %v61_v26 = vand.u32 3, %v43_v16 }
   0x8   :  { %vm73_vm2 = vcmp.eq.s32.totalorder %v56_v12, %v567_v7  ;;  %vm592_vm3 = vcmp.eq.s32.totalorder %v57_v14, %v567_v7  ;;  %v62_v27 = vand.u32 3, %v44_v17  ;;  %v45_v28 = vadd.s32 64, %v563_v2 }
   0x9   :  { %vm477_vm4 = vmpackc.low %vm73_vm2, %vm574_vm1  ;;  %vm599_vm5 = vcmp.eq.s32.totalorder %v58_v15, %v567_v7  ;;  %vm617_vm7 = vcmp.eq.s32.totalorder %v59_v21, %v567_v7  ;;  %vm622_vm8 = vcmp.eq.s32.totalorder %v60_v22, %v567_v7  ;;  %v46_v32 = vadd.s32 72, %v563_v2 }
   0xa   :  { %478 = vmatpush3.bf16.msk.msra.mxu0 %vm477_vm4, %v535_v24  ;;  %502 = vmatpush3.bf16.msk.msra.mxu1 %vm477_vm4, %v535_v24  ;;  %vm480_vm6 = vmpackc.low %vm599_vm5, %vm592_vm3  ;;  %v17_v34 = vrot.slane %v16_v25, 4  ;;  %vm638_vm10 = vcmp.eq.s32.totalorder %v61_v26, %v567_v7  ;;  %vm643_vm11 = vcmp.eq.s32.totalorder %v62_v27, %v567_v7  ;;  %v63_v37 = vand.u32 3, %v45_v28 }
   0xb   :  { %479 = vmatprep.subr.bf16.mxu0 %v532_v1  ;;  %503 = vmatprep.subr.bf16.mxu1 %v532_v1  ;;  %vm483_vm9 = vmpackc.low %vm622_vm8, %vm617_vm7  ;;  %v47_v38 = vadd.s32 80, %v563_v2  ;;  %v64_v39 = vand.u32 3, %v46_v32  ;;  %v48_v40 = vadd.s32 88, %v563_v2  ;;  %v26_v42 = vadd.f32 %v25_v33, %v24_v29 }
   0xc   :  { %v18_v41 = vadd.f32 %v17_v34, %v16_v25  ;;  %vm486_vm12 = vmpackc.low %vm643_vm11, %vm638_vm10  ;;  %vm658_vm13 = vcmp.eq.s32.totalorder %v63_v37, %v567_v7  ;;  %v49_v47 = vadd.s32 96, %v563_v2  ;;  %v50_v48 = vadd.s32 104, %v563_v2 }
   0xd   :  { %v27_v44 = vrot.slane %v26_v42, 4  ;;  %v65_v46 = vand.u32 3, %v47_v38  ;;  %vm665_vm14 = vcmp.eq.s32.totalorder %v64_v39, %v567_v7  ;;  %v66_v50 = vand.u32 3, %v48_v40 }
   0xe   :  { %481 = vmatpush3.bf16.msk.msra.mxu0 %vm480_vm6, %v535_v24  ;;  %505 = vmatpush3.bf16.msk.msra.mxu1 %vm480_vm6, %v535_v24  ;;  %v19_v43 = vrot.slane %v18_v41, 2  ;;  %vm489_vm15 = vmpackc.low %vm665_vm14, %vm658_vm13  ;;  %v67_v55 = vand.u32 3, %v49_v47  ;;  %v68_v56 = vand.u32 3, %v50_v48  ;;  %v51_v57 = vadd.s32 112, %v563_v2 }
   0xf   :  { %482 = vmatprep.subr.bf16.mxu0 %v532_v1  ;;  %506 = vmatprep.subr.bf16.mxu1 %v532_v1  ;;  %v28_v52 = vadd.f32 %v27_v44, %v26_v42  ;;  %v52_v58 = vadd.s32 120, %v563_v2  ;;  %vm680_vm0 = vcmp.eq.s32.totalorder %v65_v46, %v567_v7  ;;  %vm685_vm1 = vcmp.eq.s32.totalorder %v66_v50, %v567_v7 }
  0x10   :  { %v20_v51 = vadd.f32 %v19_v43, %v18_v41  ;;  %vm492_vm2 = vmpackc.low %vm685_vm1, %vm680_vm0  ;;  %v69_v0 = vand.u32 3, %v51_v57  ;;  %vm84_vm3 = vcmp.eq.s32.totalorder %v67_v55, %v567_v7  ;;  %vm85_vm4 = vcmp.eq.s32.totalorder %v68_v56, %v567_v7 }
  0x11   :  { %v29_v54 = vrot.slane %v28_v52, 2  ;;  %v70_v3 = vand.u32 3, %v52_v58  ;;  %vm495_vm5 = vmpackc.low %vm85_vm4, %vm84_vm3  ;;  %v300_v30 = vsub.s32 0, %v563_v2  ;;  %v306_v32 = vsub.s32 1, %v563_v2 }
  0x12   :  { %484 = vmatpush3.bf16.msk.msra.mxu0 %vm483_vm9, %v535_v24  ;;  %508 = vmatpush3.bf16.msk.msra.mxu1 %vm483_vm9, %v535_v24  ;;  %v21_v53 = vrot.slane %v20_v51, 1  ;;  %vm86_vm6 = vcmp.eq.s32.totalorder %v69_v0, %v567_v7 }
  0x13   :  { %485 = vmatprep.subr.bf16.mxu0 %v532_v1  ;;  %509 = vmatprep.subr.bf16.mxu1 %v532_v1  ;;  %v30_v62 = vadd.f32 %v29_v54, %v28_v52  ;;  %vm87_vm7 = vcmp.eq.s32.totalorder %v70_v3, %v567_v7 }
  0x14   :  { %v22_v61 = vadd.f32 %v21_v53, %v20_v51  ;;  %vm498_vm8 = vmpackc.low %vm87_vm7, %vm86_vm6 }
  0x15   :  { %v31_v63 = vrot.slane %v30_v62, 1 }
  0x16   :  { %487 = vmatpush3.bf16.msk.msra.mxu0 %vm486_vm12, %v535_v24  ;;  %511 = vmatpush3.bf16.msk.msra.mxu1 %vm486_vm12, %v535_v24  ;;  %34 = vst [vmem:[%s731_s3] sm:$0x1] %v22_v61 }
  0x17   :  { %488 = vmatprep.subr.bf16.mxu0 %v532_v1  ;;  %512 = vmatprep.subr.bf16.mxu1 %v532_v1  ;;  %v32_v4 = vadd.f32 %v31_v63, %v30_v62 }
  0x19   :  { %35 = vst [vmem:[%s732_s4] sm:$0x1] %v32_v4 }
  0x1a   :  { %490 = vmatpush3.bf16.msk.msra.mxu0 %vm489_vm15, %v535_v24  ;;  %514 = vmatpush3.bf16.msk.msra.mxu1 %vm489_vm15, %v535_v24 }
  0x1b   :  { %491 = vmatprep.subr.bf16.mxu0 %v532_v1  ;;  %515 = vmatprep.subr.bf16.mxu1 %v532_v1 }
  0x1e   :  { %493 = vmatpush3.bf16.msk.msra.mxu0 %vm492_vm2, %v535_v24  ;;  %517 = vmatpush3.bf16.msk.msra.mxu1 %vm492_vm2, %v535_v24 }
  0x1f   :  { %494 = vmatprep.subr.bf16.mxu0 %v532_v1  ;;  %518 = vmatprep.subr.bf16.mxu1 %v532_v1 }
  0x22   :  { %496 = vmatpush3.bf16.msk.msra.mxu0 %vm495_vm5, %v535_v24  ;;  %520 = vmatpush3.bf16.msk.msra.mxu1 %vm495_vm5, %v535_v24 }
  0x23   :  { %497 = vmatprep.subr.bf16.mxu0 %v532_v1  ;;  %521 = vmatprep.subr.bf16.mxu1 %v532_v1 }
  0x26   :  { %499 = vmatpush3.bf16.msk.msra.mxu0 %vm498_vm8, %v535_v24  ;;  %523 = vmatpush3.bf16.msk.msra.mxu1 %vm498_vm8, %v535_v24  ;;  %v291_v24 = vrot.slane %v260_v6, 1 }
  0x29   :  { %439 = vmatmul.mubr.f32.vlgmr.msra.gmra.mrb[0].mxu0 %v22_v61  ;;  %474 = vmatmul.mubr.f32.vlgmr.msra.gmra.mrb[0].mxu1 %v32_v4 }
  0xfc   :  { %v186_v5 = vpop.f32.mrb[0].mxu0  ;;  %v256_v7 = vpop.f32.mrb[0].mxu1 }
  0xfd   :  { %v262_v8 = vrot.slane %v186_v5, 5  ;;  %v440_v9 = vpop.f32.mrb[1].mxu0  ;;  %v270_v10 = vrot.slane %v256_v7, 5  ;;  %v475_v11 = vpop.f32.mrb[1].mxu1 }
  0xff   :  { %v264_v12 = vmul.f32 %v262_v8, %v260_v6  ;;  %v272_v13 = vmul.f32 %v270_v10, %v260_v6 }
 0x101   :  { %v266_v14 = vrot.slane %v264_v12, 3  ;;  %v274_v1 = vrot.slane %v272_v13, 2 }
 0x103   :  { %v268_v15 = vadd.f32 %v266_v14, %v260_v6  ;;  %v276_v17 = vadd.f32 %v274_v1, %v260_v6 }
 0x105   :  { %v277_v16 = vmul.f32 %v268_v15, %v268_v15  ;;  %v301_v31 = vrot.slane %v268_v15, %v300_v30 }
 0x107   :  { %v279_v20 = vrot.slane %v277_v16, 7  ;;  %v302_v34 = vsub.f32 %v583_v18, %v301_v31  ;;  %v303_v35 = vsub.f32 %v588_v19, %v301_v31 }
 0x109   :  { %v281_v21 = vsub.f32 %v276_v17, %v279_v20 }
 0x10b   :  { %v282_v22 = vmax.f32 %v281_v21, 0.0 }
 0x10d   :  { %528 = vrsqrt.f32 %v282_v22  ;;  %vm285_vm9 = vcmp.eq.f32.partialorder %v282_v22, inf  ;;  %v288_v26 = vand.u32 2147483648, %v282_v22  ;;  %vm287_vm10 = vcmp.eq.f32.partialorder %v282_v22, 0.0 }
 0x117   :  { %v529_v23 = vpop.eup %528 }
 0x118   :  { %v284_v25 = vmul.f32 %v529_v23, %v282_v22 }
 0x11a   :  { %v286_v27 = vsel %vm285_vm9, %v282_v22, %v284_v25 }
 0x11b   :  { %v289_v28 = vsel %vm287_vm10, %v288_v26, %v286_v27 }
 0x11c   :  { %v293_v29 = vmax.f32 %v289_v28, %v291_v24 }
 0x11e   :  { %530 = vrcp.f32 %v293_v29 }
 0x128   :  { %v531_v33 = vpop.eup %530 }
 0x129   :  { %v307_v36 = vrot.slane %v531_v33, %v306_v32 }
 0x12b   :  { %v308_v37 = vmul.f32 %v307_v36, %v302_v34  ;;  %v309_v38 = vmul.f32 %v307_v36, %v303_v35 }
 0x12d   :  { %310 = vst [vmem:[%s734_s2] sm:$0xff] %v308_v37  ;;  %311 = vst [vmem:[%s734_s2 + $0x8] sm:$0xff] %v309_v38 }

</bundles_post_ra>
